<compile_context>
chip_gen: v7x
topology: tpu7x:2x2x1
jax: 0.10.0
libtpu: 0.0.40
codegen_flags: <defaults>
</compile_context>

<pallas_src>
import jax
import jax.numpy as jnp
from jax.experimental import pallas as pl
from jax.experimental.pallas import tpu as pltpu

SE_PRIMITIVES = ("none", "skip_connect", "relu", "tanh", "sigmoid")
NUM_OPS = len(SE_PRIMITIVES)

# The kernel body hard-codes this ordering (w[:,0]='none' dropped, w[:,1..4] used).
assert SE_PRIMITIVES == ("none", "skip_connect", "relu", "tanh", "sigmoid"), (
    "kernel hard-codes the ('none','skip_connect','relu','tanh','sigmoid') ordering"
)

LANE = 128
MAX_TILE_ROWS = 4096          # 4096 x 128 x 4B = 2 MiB per buffer (f32)
MIN_GRID_STEPS = 8            # keep both v7x TensorCores fed on the parallel axis
VMEM_BUDGET = 16 * 1024 * 1024  # cap for double-buffered in+out tiles (v7x-safe)


def _sublane_multiple(dtype):
    """Second-to-last block-dim multiple required for this dtype's packing."""
    itemsize = jnp.dtype(dtype).itemsize
    return max(8, 32 // itemsize)  # f32 -> 8, bf16 -> 16, int8/fp8 -> 32


def _tile_rows_budget(num_tensors, itemsize):
    """Largest tile-row count whose double-buffered footprint fits the budget."""
    per_row_bytes = LANE * itemsize
    # Pallas double-buffers every tiled input and output: 2 * (I + I) buffers.
    max_rows = VMEM_BUDGET // (4 * num_tensors * per_row_bytes)
    tr = min(MAX_TILE_ROWS, int(max_rows))
    tr = max(tr - (tr % 32), 32)  # multiple of 32 -> legal for every dtype
    return tr


def _choose_tile_rows(R, tile_limit, sublane):
    """Pick tile rows: <= tile_limit, sublane-legal, and >= MIN_GRID_STEPS steps
    whenever the tensor is big enough (so the grid shards across v7x's 2 TCs)."""
    tile_limit = max(tile_limit, sublane)
    if R <= tile_limit:
        tr = pl.cdiv(R, MIN_GRID_STEPS)
        tr = ((tr + sublane - 1) // sublane) * sublane  # round up to sublane mult.
        return min(tr, R)  # == R (full extent) is always legal
    return tile_limit - (tile_limit % sublane)


def _make_fused_kernel(num_tensors):
    """Kernel over one (tr, LANE) row-tile of each of the I hidden states.

    w_ref : SMEM (I, NUM_OPS) f32 -- mixing weights
    refs  : I input VMEM tiles followed by I output VMEM tiles
    """

    def kernel(w_ref, *refs):
        h_refs = refs[:num_tensors]
        o_refs = refs[num_tensors:]
        for i in range(num_tensors):
            x = h_refs[i][...].astype(jnp.float32)
            # 'none' (index 0) contributes w * 0 == 0 and is dropped entirely.
            acc = w_ref[i, 1] * x                              # skip_connect (VPU)
            acc = acc + w_ref[i, 2] * jnp.maximum(x, 0.0)      # relu         (VPU)
            acc = acc + w_ref[i, 3] * jnp.tanh(x)              # tanh         (EUP)
            acc = acc + w_ref[i, 4] * jax.lax.logistic(x)      # sigmoid: 1 EUP op
            o_refs[i][...] = acc.astype(o_refs[i].dtype)

    return kernel


def _se_mixed_fused(h_list, weights):
    """One fused pallas_call over all hidden states (must share shape & dtype)."""
    num_tensors = len(h_list)
    orig_shape = h_list[0].shape
    orig_dtype = h_list[0].dtype
    total = h_list[0].size
    itemsize = jnp.dtype(orig_dtype).itemsize
    sublane = _sublane_multiple(orig_dtype)

    # Pad only to a LANE multiple; typical activation sizes already are, so the
    # common case has zero extra HBM traffic from pad/slice.
    pad = (-total) % LANE
    flats = []
    for h in h_list:
        flat = h.reshape(-1)  # contiguous reshape: no data movement
        if pad:
            # TODO(synk): rare path (<128 pad elems) still costs one extra HBM
            # round trip via jnp.pad; typical NCHW activations never hit it.
            flat = jnp.pad(flat, (0, pad))
        flats.append(flat.reshape(-1, LANE))
    R = flats[0].shape[0]

    tile_limit = _tile_rows_budget(num_tensors, itemsize)
    tr = _choose_tile_rows(R, tile_limit, sublane)
    grid = (pl.cdiv(R, tr),)

    row_spec = pl.BlockSpec((tr, LANE), lambda r: (r, 0))

    outs = pl.pallas_call(
        _make_fused_kernel(num_tensors),
        out_shape=[jax.ShapeDtypeStruct((R, LANE), orig_dtype)
                   for _ in range(num_tensors)],
        grid_spec=pltpu.PrefetchScalarGridSpec(
            num_scalar_prefetch=0,
            grid=grid,
            in_specs=[
                # small per-tensor mixing-weight table, untiled, in scalar memory
                pl.BlockSpec(memory_space=pltpu.MemorySpace.SMEM),
            ] + [row_spec] * num_tensors,
            out_specs=[row_spec for _ in range(num_tensors)],
        ),
        compiler_params=pltpu.CompilerParams(
            dimension_semantics=("parallel",),
            vmem_limit_bytes=32 * 1024 * 1024,  # budgeted usage <= ~16 MiB
        ),
    )(weights.astype(jnp.float32), *flats)

    results = []
    for o in outs:
        flat = o.reshape(-1)
        if pad:
            flat = flat[:total]
        results.append(flat.reshape(orig_shape))
    return results


def se_mixed_op(h_list, weights):
    """Pallas implementation of SeMixedOp.forward(h_list, weights)."""
    num_tensors = len(h_list)
    assert weights.shape == (num_tensors, NUM_OPS)
    same = all(
        h.shape == h_list[0].shape and h.dtype == h_list[0].dtype for h in h_list
    )
    if same:
        # Normal DARTS case: one fused call, one dispatch, one pipeline.
        return _se_mixed_fused(h_list, weights)
    # Mixed shapes: fall back to one call per tensor (still fused over ops).
    return [
        _se_mixed_fused([h_list[i]], weights[i:i + 1])[0]
        for i in range(num_tensors)
    ]


def _se_mixed_ref(h_list, weights):
    """Plain-JAX reference mirroring the PyTorch forward."""
    res = []
    for i, h in enumerate(h_list):
        ops = [
            jnp.zeros_like(h),          # none
            h,                          # skip_connect
            jnp.maximum(h, 0.0),        # relu
            jnp.tanh(h),                # tanh
            jax.nn.sigmoid(h),          # sigmoid
        ]
        res.append(sum(weights[i, k] * ops[k] for k in range(NUM_OPS)))
    return res


if __name__ == "__main__":
    key = jax.random.PRNGKey(0)
    k_h, k_w = jax.random.split(key)

    # Small shapes consistent with the module's forward: a list of NCHW tensors
    # plus a (len(h_list), num_ops) weight matrix.
    B, C, H, W = 2, 4, 16, 16
    I = 3

    h_keys = jax.random.split(k_h, I)
    h_list = [
        jax.random.normal(h_keys[i], (B, C, H, W), dtype=jnp.float32)
        for i in range(I)
    ]
    # DARTS-style architecture weights (softmax over ops per edge).
    weights = jax.nn.softmax(
        jax.random.normal(k_w, (I, NUM_OPS), dtype=jnp.float32), axis=-1
    )

    out_list = se_mixed_op(h_list, weights)
    out_list = [jax.block_until_ready(o) for o in out_list]

    ref_list = _se_mixed_ref(h_list, weights)
    for o, r in zip(out_list, ref_list):
        assert o.shape == r.shape and o.dtype == r.dtype
        assert jnp.allclose(o, r, atol=1e-5, rtol=1e-5)

    print("KERNEL_OK")
</pallas_src>

<mosaic_0001>
module attributes {stable_mosaic.version = 11 : i64} {
  func.func @kernel(%arg0: i32, %arg1: memref<3x5xf32, #tpu.memory_space<smem>>, %arg2: memref<8x128xf32, #tpu.memory_space<vmem>>, %arg3: memref<8x128xf32, #tpu.memory_space<vmem>>, %arg4: memref<8x128xf32, #tpu.memory_space<vmem>>, %arg5: memref<8x128xf32, #tpu.memory_space<vmem>>, %arg6: memref<8x128xf32, #tpu.memory_space<vmem>>, %arg7: memref<8x128xf32, #tpu.memory_space<vmem>>) attributes {dimension_semantics = [#tpu.dimension_semantics<parallel>], iteration_bounds = array<i64: 2>, scalar_prefetch = 0 : i64, scratch_operands = 0 : i64, tpu.core_type = #tpu.core_type<tc>, window_params = [{transform_indices = @transform_0, window_bounds = array<i64: 3, 5>}, {transform_indices = @transform_1, window_bounds = array<i64: 8, 128>}, {transform_indices = @transform_2, window_bounds = array<i64: 8, 128>}, {transform_indices = @transform_3, window_bounds = array<i64: 8, 128>}, {transform_indices = @transform_4, window_bounds = array<i64: 8, 128>}, {transform_indices = @transform_5, window_bounds = array<i64: 8, 128>}, {transform_indices = @transform_6, window_bounds = array<i64: 8, 128>}]} {
    %c0 = arith.constant 0 : index
    %c0_0 = arith.constant 0 : index
    %0 = vector.load %arg2[%c0, %c0_0] : memref<8x128xf32, #tpu.memory_space<vmem>>, vector<8x128xf32>
    %c0_1 = arith.constant 0 : index
    %c1 = arith.constant 1 : index
    %1 = memref.load %arg1[%c0_1, %c1] : memref<3x5xf32, #tpu.memory_space<smem>>
    %2 = vector.broadcast %1 : f32 to vector<8x128xf32>
    %3 = arith.mulf %2, %0 : vector<8x128xf32>
    %c0_2 = arith.constant 0 : index
    %c2 = arith.constant 2 : index
    %4 = memref.load %arg1[%c0_2, %c2] : memref<3x5xf32, #tpu.memory_space<smem>>
    %cst = arith.constant 0.000000e+00 : f32
    %5 = vector.broadcast %cst : f32 to vector<8x128xf32>
    %6 = arith.maximumf %0, %5 : vector<8x128xf32>
    %7 = vector.broadcast %4 : f32 to vector<8x128xf32>
    %8 = arith.mulf %7, %6 : vector<8x128xf32>
    %9 = arith.addf %3, %8 : vector<8x128xf32>
    %c0_3 = arith.constant 0 : index
    %c3 = arith.constant 3 : index
    %10 = memref.load %arg1[%c0_3, %c3] : memref<3x5xf32, #tpu.memory_space<smem>>
    %11 = math.tanh %0 : vector<8x128xf32>
    %12 = vector.broadcast %10 : f32 to vector<8x128xf32>
    %13 = arith.mulf %12, %11 : vector<8x128xf32>
    %14 = arith.addf %9, %13 : vector<8x128xf32>
    %c0_4 = arith.constant 0 : index
    %c4 = arith.constant 4 : index
    %15 = memref.load %arg1[%c0_4, %c4] : memref<3x5xf32, #tpu.memory_space<smem>>
    %16 = arith.negf %0 : vector<8x128xf32>
    %17 = math.exp %16 : vector<8x128xf32>
    %cst_5 = arith.constant 1.000000e+00 : f32
    %18 = vector.broadcast %cst_5 : f32 to vector<8x128xf32>
    %19 = arith.addf %18, %17 : vector<8x128xf32>
    %20 = arith.divf %18, %19 : vector<8x128xf32>
    %21 = vector.broadcast %15 : f32 to vector<8x128xf32>
    %22 = arith.mulf %21, %20 : vector<8x128xf32>
    %23 = arith.addf %14, %22 : vector<8x128xf32>
    %c0_6 = arith.constant 0 : index
    %c0_7 = arith.constant 0 : index
    %24 = vector.load %arg5[%c0_6, %c0_7] : memref<8x128xf32, #tpu.memory_space<vmem>>, vector<8x128xf32>
    tpu.vector_store %arg5[%c0_6, %c0_7], %23 {strides = array<i32>} : memref<8x128xf32, #tpu.memory_space<vmem>>, vector<8x128xf32>,
    %c0_8 = arith.constant 0 : index
    %c0_9 = arith.constant 0 : index
    %25 = vector.load %arg3[%c0_8, %c0_9] : memref<8x128xf32, #tpu.memory_space<vmem>>, vector<8x128xf32>
    %c1_10 = arith.constant 1 : index
    %c1_11 = arith.constant 1 : index
    %26 = memref.load %arg1[%c1_10, %c1_11] : memref<3x5xf32, #tpu.memory_space<smem>>
    %27 = vector.broadcast %26 : f32 to vector<8x128xf32>
    %28 = arith.mulf %27, %25 : vector<8x128xf32>
    %c1_12 = arith.constant 1 : index
    %c2_13 = arith.constant 2 : index
    %29 = memref.load %arg1[%c1_12, %c2_13] : memref<3x5xf32, #tpu.memory_space<smem>>
    %cst_14 = arith.constant 0.000000e+00 : f32
    %30 = vector.broadcast %cst_14 : f32 to vector<8x128xf32>
    %31 = arith.maximumf %25, %30 : vector<8x128xf32>
    %32 = vector.broadcast %29 : f32 to vector<8x128xf32>
    %33 = arith.mulf %32, %31 : vector<8x128xf32>
    %34 = arith.addf %28, %33 : vector<8x128xf32>
    %c1_15 = arith.constant 1 : index
    %c3_16 = arith.constant 3 : index
    %35 = memref.load %arg1[%c1_15, %c3_16] : memref<3x5xf32, #tpu.memory_space<smem>>
    %36 = math.tanh %25 : vector<8x128xf32>
    %37 = vector.broadcast %35 : f32 to vector<8x128xf32>
    %38 = arith.mulf %37, %36 : vector<8x128xf32>
    %39 = arith.addf %34, %38 : vector<8x128xf32>
    %c1_17 = arith.constant 1 : index
    %c4_18 = arith.constant 4 : index
    %40 = memref.load %arg1[%c1_17, %c4_18] : memref<3x5xf32, #tpu.memory_space<smem>>
    %41 = arith.negf %25 : vector<8x128xf32>
    %42 = math.exp %41 : vector<8x128xf32>
    %cst_19 = arith.constant 1.000000e+00 : f32
    %43 = vector.broadcast %cst_19 : f32 to vector<8x128xf32>
    %44 = arith.addf %43, %42 : vector<8x128xf32>
    %45 = arith.divf %43, %44 : vector<8x128xf32>
    %46 = vector.broadcast %40 : f32 to vector<8x128xf32>
    %47 = arith.mulf %46, %45 : vector<8x128xf32>
    %48 = arith.addf %39, %47 : vector<8x128xf32>
    %c0_20 = arith.constant 0 : index
    %c0_21 = arith.constant 0 : index
    %49 = vector.load %arg6[%c0_20, %c0_21] : memref<8x128xf32, #tpu.memory_space<vmem>>, vector<8x128xf32>
    tpu.vector_store %arg6[%c0_20, %c0_21], %48 {strides = array<i32>} : memref<8x128xf32, #tpu.memory_space<vmem>>, vector<8x128xf32>,
    %c0_22 = arith.constant 0 : index
    %c0_23 = arith.constant 0 : index
    %50 = vector.load %arg4[%c0_22, %c0_23] : memref<8x128xf32, #tpu.memory_space<vmem>>, vector<8x128xf32>
    %c2_24 = arith.constant 2 : index
    %c1_25 = arith.constant 1 : index
    %51 = memref.load %arg1[%c2_24, %c1_25] : memref<3x5xf32, #tpu.memory_space<smem>>
    %52 = vector.broadcast %51 : f32 to vector<8x128xf32>
    %53 = arith.mulf %52, %50 : vector<8x128xf32>
    %c2_26 = arith.constant 2 : index
    %c2_27 = arith.constant 2 : index
    %54 = memref.load %arg1[%c2_26, %c2_27] : memref<3x5xf32, #tpu.memory_space<smem>>
    %cst_28 = arith.constant 0.000000e+00 : f32
    %55 = vector.broadcast %cst_28 : f32 to vector<8x128xf32>
    %56 = arith.maximumf %50, %55 : vector<8x128xf32>
    %57 = vector.broadcast %54 : f32 to vector<8x128xf32>
    %58 = arith.mulf %57, %56 : vector<8x128xf32>
    %59 = arith.addf %53, %58 : vector<8x128xf32>
    %c2_29 = arith.constant 2 : index
    %c3_30 = arith.constant 3 : index
    %60 = memref.load %arg1[%c2_29, %c3_30] : memref<3x5xf32, #tpu.memory_space<smem>>
    %61 = math.tanh %50 : vector<8x128xf32>
    %62 = vector.broadcast %60 : f32 to vector<8x128xf32>
    %63 = arith.mulf %62, %61 : vector<8x128xf32>
    %64 = arith.addf %59, %63 : vector<8x128xf32>
    %c2_31 = arith.constant 2 : index
    %c4_32 = arith.constant 4 : index
    %65 = memref.load %arg1[%c2_31, %c4_32] : memref<3x5xf32, #tpu.memory_space<smem>>
    %66 = arith.negf %50 : vector<8x128xf32>
    %67 = math.exp %66 : vector<8x128xf32>
    %cst_33 = arith.constant 1.000000e+00 : f32
    %68 = vector.broadcast %cst_33 : f32 to vector<8x128xf32>
    %69 = arith.addf %68, %67 : vector<8x128xf32>
    %70 = arith.divf %68, %69 : vector<8x128xf32>
    %71 = vector.broadcast %65 : f32 to vector<8x128xf32>
    %72 = arith.mulf %71, %70 : vector<8x128xf32>
    %73 = arith.addf %64, %72 : vector<8x128xf32>
    %c0_34 = arith.constant 0 : index
    %c0_35 = arith.constant 0 : index
    %74 = vector.load %arg7[%c0_34, %c0_35] : memref<8x128xf32, #tpu.memory_space<vmem>>, vector<8x128xf32>
    tpu.vector_store %arg7[%c0_34, %c0_35], %73 {strides = array<i32>} : memref<8x128xf32, #tpu.memory_space<vmem>>, vector<8x128xf32>,
    return
  }
  func.func @transform_0(%arg0: i32) -> (i32, i32) {
    %c0_i32 = arith.constant 0 : i32
    %c0_i32_0 = arith.constant 0 : i32
    %c0_i32_1 = arith.constant 0 : i32
    return %c0_i32, %c0_i32_0 : i32, i32
  }
  func.func @transform_1(%arg0: i32) -> (i32, i32) {
    %c0_i32 = arith.constant 0 : i32
    %c0_i32_0 = arith.constant 0 : i32
    return %arg0, %c0_i32 : i32, i32
  }
  func.func @transform_2(%arg0: i32) -> (i32, i32) {
    %c0_i32 = arith.constant 0 : i32
    %c0_i32_0 = arith.constant 0 : i32
    return %arg0, %c0_i32 : i32, i32
  }
  func.func @transform_3(%arg0: i32) -> (i32, i32) {
    %c0_i32 = arith.constant 0 : i32
    %c0_i32_0 = arith.constant 0 : i32
    return %arg0, %c0_i32 : i32, i32
  }
  func.func @transform_4(%arg0: i32) -> (i32, i32) {
    %c0_i32 = arith.constant 0 : i32
    %c0_i32_0 = arith.constant 0 : i32
    return %arg0, %c0_i32 : i32, i32
  }
  func.func @transform_5(%arg0: i32) -> (i32, i32) {
    %c0_i32 = arith.constant 0 : i32
    %c0_i32_0 = arith.constant 0 : i32
    return %arg0, %c0_i32 : i32, i32
  }
  func.func @transform_6(%arg0: i32) -> (i32, i32) {
    %c0_i32 = arith.constant 0 : i32
    %c0_i32_0 = arith.constant 0 : i32
    return %arg0, %c0_i32 : i32, i32
  }
}

</mosaic_0001>

<bundles_post_ra>
// kernel: tpu_custom_call.1
= control target key start
LH: loop header
LB: loop body
LE: loop exit
PB: predicated region body
PF: predicated region fallthrough
CT: control target
= control target key end

     0   :  { %s1478_s0 = inlined_call_operand.hbm [shape: f32[3,5], index: 0, kind: input, shape index: {}]   ;;  %s1479_s1 = inlined_call_operand.hbm [shape: f32[16,128], index: 1, kind: input, shape index: {}]   ;;  %s1480_s2 = inlined_call_operand.hbm [shape: f32[16,128], index: 2, kind: input, shape index: {}]   ;;  %s1481_s3 = inlined_call_operand.hbm [shape: f32[16,128], index: 3, kind: input, shape index: {}]   ;;  %s1482_s4 = inlined_call_operand.hbm [shape: f32[16,128], index: 4, kind: output, shape index: {0}]   ;;  %s1483_s5 = inlined_call_operand.hbm [shape: f32[16,128], index: 5, kind: output, shape index: {1}]   ;;  %s1484_s6 = inlined_call_operand.hbm [shape: f32[16,128], index: 6, kind: output, shape index: {2}]  }
   0x1   :  { %1497 = sst [smem:[#allocation22_spill]] %s1480_s2 }
   0x2   :  { %12 = vsyncpa [#allocation5], 0 }
   0x3   :  { %13 = vsyncpa [#allocation3], 0 }
   0x4   :  { %15 = vsyncpa [#allocation3 + $0x1], 0 }
   0x5   :  { %16 = vsyncpa [#allocation8], 0 }
   0x6   :  { %18 = vsyncpa [#allocation8 + $0x1], 0 }
   0x7   :  { %19 = vsyncpa [#allocation4], 0 }
   0x8   :  { %21 = vsyncpa [#allocation4 + $0x1], 0 }
   0x9   :  { %22 = vsyncpa [#allocation12], 0 }
   0xa   :  { %24 = vsyncpa [#allocation12 + $0x1], 0  ;;  %s1096_s21 = smov 0   ;;  %s1098_s22 = smov 0  }
   0xb   :  { %s1100_s23 = smov 0   ;;  %s1102_s24 = smov 0  }
   0xc LB: > { %1498 = sst [smem:[#allocation19_spill]] %s1048_s23  ;;  %s1117_s25 = sadd.s32 1, %s1052_s24   ;;  %s1052_s24 = sphi %s1102_s24, %s1522_s24   ;;  %s1048_s23 = sphi %s1100_s23, %s1524_s23   ;;  %s1044_s22 = sphi %s1098_s22, %s1526_s22   ;;  %s1040_s21 = sphi %s1096_s21, %s1525_s21  }
   0xd   : > { %1499 = sst [smem:[#allocation20_spill]] %s1117_s25  ;;  %s58_s26 = sadd.s32 1, %s1048_s23 }
   0xe   : > { %s55_s27 = ssub.s32 %s1052_s24, %s1117_s25  ;;  %p1485_p0 = scmp.ne.s32.totalorder %s1048_s23, %s1044_s22 }
   0xf   : > { %p56_p1 = scmp.eq.s32.totalorder %s55_s27, 0  ;;  %p66_p2 = scmp.eq.s32.totalorder %s1052_s24, 0 }
  0x10   : > { %p761_p4 = scmp.lt.s32.totalorder %s1052_s24, 2  ;;  %s234_s29 = sand.u32 1, %s1048_s23  }
  0x11   : > { %s1128_s28 = scalar_select %p56_p1, %s1048_s23, %s58_s26  }
  0x12   : > { %p67_p5 = por %p66_p2, %p1485_p0  ;;  %s1136_s30 = sshll.u32 %s234_s29, 3 }
  0x13   : > { %1500 = sst [smem:[#allocation21_spill]] %s1128_s28  ;;  %s1139_s7 = sshll.u32 %s1052_s24, 7 }
  0x14   : > { %p1141_p6 = pnand %p761_p4, %p67_p5  ;;  %s252_s9 = sand.u32 1, %s1052_s24  }
  0x15   : > { %s1502_s2 = sld [smem:[#allocation22_spill]]  ;;  %s256_s13 = scalar_lea.vmem [#allocation7], %s1136_s30 }
  0x16   : > { %s1501_s8 = scalar_select %p1141_p6, 1, 0 }
  0x17   : > { %s263_s14 = sshll.u32 %s256_s13, 4  ;;  %s1155_s15 = scalar_lea.sflag [#allocation8], %s252_s9  ;;  %s1153_s14 = int_to_ptr.vmem [resolvable:$true] %s263_s14 }
  0x18   : > { %p1161_p8 = pneg %p1141_p6 }
  0x1b   : > { %s1150_s12 = scalar_lea.hbm %s1502_s2, %s1139_s7  ;;  %s820_s20 = scalar_lea.hbm %s1502_s2, 256 }
  0x1c   : > { %s815_s16 = scalar_lea.hbm %s1150_s12, 128  ;;  %p821_p11 = scmp.lt.u32.totalorder %s1150_s12, %s1502_s2 }
  0x1d   : > { %p816_p7 = scmp.ne.s32.totalorder %s1150_s12, %s815_s16  ;;  %p822_p12 = scmp.lt.u32.totalorder %s820_s20, %s815_s16 }
  0x1e   : > { %p824_p1 = scmp.lt.u32.totalorder %s815_s16, %s1150_s12 }
  0x1f   : > { %p818_p9 = pnand %p1161_p8, %p816_p7  ;;  %p823_p13 = por %p822_p12, %p821_p11 }
  0x21   : > { %p819_p10 = pneg %p818_p9  ;;  %p825_p2 = por %p824_p1, %p823_p13 }
  0x23   : > { %p826_p4 = pnand %p825_p2, %p819_p10 }
  0x25   : > { %829 = shalt.err (!%p826_p4)
}
  0x26   : > { %s830_s9 = scalar_lea.vmem %s1153_s14, 128  ;;  %s1054_s10 = smov [#allocation7]  }
  0x27   : > { %p831_p5 = scmp.ne.s32.totalorder %s1153_s14, %s830_s9  ;;  %s835_s11 = sshll.u32 %s1054_s10, 4  ;;  %s836_s11 = int_to_ptr.vmem [resolvable:$false] %s835_s11 }
  0x28   : > { %s837_s13 = scalar_lea.vmem %s836_s11, 256  ;;  %p838_p3 = scmp.lt.s32.totalorder %s1153_s14, %s836_s11 }
  0x29   : > { %p833_p7 = pnand %p831_p5, %p1161_p8  ;;  %p839_p0 = scmp.lt.s32.totalorder %s837_s13, %s830_s9 }
  0x2b   : > { %p834_p9 = pneg %p833_p7  ;;  %p840_p11 = por %p839_p0, %p838_p3 }
  0x2d   : > { %p841_p12 = pnand %p840_p11, %p834_p9 }
  0x2f   : > { %844 = shalt.err (!%p841_p12)
}
  0x30   : > { %746 = dma.hbm_to_vmem [thread:$0]  (!%p1141_p6), %s1150_s12, 128, %s1153_s14, %s1155_s15  }
  0x31   : > { %s1186_s16 = sadd.s32 4294967295, %s1052_s24   ;;  %s1486_s18 = sadd.s32 4294967294, %s1052_s24  }
  0x32   : > { %p71_p0 = scmp.ne.s32.totalorder %s1044_s22, %s1040_s21  ;;  %p1489_p3 = scmp.eq.s32.totalorder %s1186_s16, 0 }
  0x33   : > { %p147_p10 = scmp.eq.s32.totalorder %s1186_s16, 1  ;;  %p153_p13 = scmp.eq.s32.totalorder %s1486_s18, 1 }
  0x34   : > { %p1197_p1 = por %p1489_p3, %p71_p0  ;;  %p680_p2 = scmp.ge.s32.totalorder %s1052_s24, 1 }
  0x35   : > { %p1505_p4 = scmp.ne.s32.totalorder %s1048_s23, %s1044_s22  ;;  %p1209_p7 = por %p153_p13, %p71_p0 }
  0x36   : > { %s1504_s19 = scalar_select %p1197_p1, 1, 0 }
  0x37   : > { %p1205_p5 = por %p147_p10, %p1505_p4  ;;  %p212_p9 = scmp.lt.s32.totalorder %s1052_s24, 3 }
  0x38   : > { %s1507_s14 = scalar_select %p1209_p7, 1, 0 }
  0x39   : > { %s1506_s12 = scalar_select %p1205_p5, 1, 0 }
  0x3a   : > { %p1214_p11 = pnand %p680_p2, %p212_p9  ;;  %s1222_s9 = scalar_lea.hbm %s1479_s1, %s1139_s7 }
  0x3b   : > { %s238_s10 = scalar_lea.vmem [#allocation6], %s1136_s30  ;;  %s235_s13 = scalar_lea.sflag [#allocation3], %s234_s29 }
  0x3c   : > { %s1508_s20 = scalar_select %p1214_p11, 1, 0 }
  0x3d   : > { %s245_s11 = sshll.u32 %s238_s10, 4  ;;  %s845_s18 = scalar_lea.hbm %s1222_s9, 128  ;;  %s246_s11 = int_to_ptr.vmem [resolvable:$true] %s245_s11 }
  0x3e   : > { %p846_p0 = scmp.ne.s32.totalorder %s1222_s9, %s845_s18  ;;  %s850_s2 = scalar_lea.hbm %s1479_s1, 256 }
  0x3f   : > { %p851_p2 = scmp.lt.u32.totalorder %s1222_s9, %s1479_s1  ;;  %p852_p4 = scmp.lt.u32.totalorder %s850_s2, %s845_s18 }
  0x40   : > { %p848_p10 = pnand %p846_p0, %p1161_p8  ;;  %p854_p3 = scmp.lt.u32.totalorder %s845_s18, %s1222_s9 }
  0x41   : > { %p853_p9 = por %p852_p4, %p851_p2 }
  0x42   : > { %p849_p13 = pneg %p848_p10 }
  0x43   : > { %p855_p12 = por %p854_p3, %p853_p9 }
  0x45   : > { %p856_p7 = pnand %p855_p12, %p849_p13 }
  0x47   : > { %859 = shalt.err (!%p856_p7)
}
  0x48   : > { %s860_s29 = scalar_lea.vmem %s246_s11, 128  ;;  %s1055_s10 = smov [#allocation6]  }
  0x49   : > { %p861_p5 = scmp.ne.s32.totalorder %s246_s11, %s860_s29  ;;  %s865_s23 = sshll.u32 %s1055_s10, 4  ;;  %s866_s23 = int_to_ptr.vmem [resolvable:$false] %s865_s23 }
  0x4a   : > { %s867_s26 = scalar_lea.vmem %s866_s23, 256  ;;  %p868_p1 = scmp.lt.s32.totalorder %s246_s11, %s866_s23 }
  0x4b   : > { %p863_p0 = pnand %p861_p5, %p1161_p8  ;;  %p869_p11 = scmp.lt.s32.totalorder %s867_s26, %s860_s29 }
  0x4d   : > { %p864_p10 = pneg %p863_p0  ;;  %p870_p6 = por %p869_p11, %p868_p1 }
  0x4f   : > { %p871_p2 = pnand %p870_p6, %p864_p10 }
  0x51   : > { %874 = shalt.err (!%p871_p2)
}
  0x52   : > { %p1509_p4 = scmp.ne.s32.totalorder %s1501_s8, 0  ;;  %p1510_p3 = scmp.eq.s32.totalorder %s1186_s16, 0 }
  0x53   : > { %p1511_p5 = scmp.ne.s32.totalorder %s1508_s20, 0  ;;  %s1259_s28 = scalar_lea.hbm %s1481_s3, %s1139_s7 }
  0x54   : > { %743 = dma.hbm_to_vmem [thread:$0]  (!%p1509_p4), %s1222_s9, 128, %s246_s11, %s235_s13  }
  0x55   : > { %p1512_p7 = pneg %p1511_p5  ;;  %s274_s18 = scalar_lea.vmem [#allocation9], %s1136_s30 }
  0x56   : > { %s281_s27 = sshll.u32 %s274_s18, 4  ;;  %s875_s9 = scalar_lea.hbm %s1478_s0, 64  ;;  %s1262_s27 = int_to_ptr.vmem [resolvable:$true] %s281_s27 }
  0x57   : > { %p1251_p12 = pnand %p1512_p7, %p1510_p3  ;;  %p876_p6 = scmp.ne.s32.totalorder %s1478_s0, %s875_s9 }
  0x58   : > { %p882_p9 = scmp.lt.u32.totalorder %s875_s9, %s1478_s0 }
  0x59   : > { %p877_p1 = pneg %p1251_p12 }
  0x5b   : > { %p878_p11 = pnand %p877_p1, %p876_p6 }
  0x5d   : > { %p879_p13 = pneg %p878_p11 }
  0x5f   : > { %p884_p0 = pnand %p882_p9, %p879_p13 }
  0x61   : > { %887 = shalt.err (!%p884_p0)
}
  0x62   : > { %s1056_s30 = smov [#allocation2]   ;;  %s888_s18 = scalar_lea.hbm %s1259_s28, 128 }
  0x63   : > { %739 = dma.hbm_to_smem (!%p1251_p12), %s1478_s0, 64, %s1056_s30, [#allocation5]  }
  0x64   : > { %p889_p10 = scmp.ne.s32.totalorder %s1259_s28, %s888_s18  ;;  %s893_s9 = scalar_lea.hbm %s1481_s3, 256 }
  0x65   : > { %p894_p7 = scmp.lt.u32.totalorder %s1259_s28, %s1481_s3  ;;  %p895_p6 = scmp.lt.u32.totalorder %s893_s9, %s888_s18 }
  0x66   : > { %p891_p2 = pnand %p889_p10, %p1161_p8  ;;  %p897_p11 = scmp.lt.u32.totalorder %s888_s18, %s1259_s28 }
  0x67   : > { %p896_p1 = por %p895_p6, %p894_p7 }
  0x68   : > { %p892_p3 = pneg %p891_p2 }
  0x69   : > { %p898_p13 = por %p897_p11, %p896_p1 }
  0x6b   : > { %p899_p9 = pnand %p898_p13, %p892_p3 }
  0x6d   : > { %902 = shalt.err (!%p899_p9)
}
  0x6e   : > { %s903_s13 = scalar_lea.vmem %s1262_s27, 128  ;;  %s1057_s26 = smov [#allocation9]  }
  0x6f   : > { %p904_p12 = scmp.ne.s32.totalorder %s1262_s27, %s903_s13  ;;  %s908_s23 = sshll.u32 %s1057_s26, 4  ;;  %s909_s23 = int_to_ptr.vmem [resolvable:$false] %s908_s23 }
  0x70   : > { %s910_s30 = scalar_lea.vmem %s909_s23, 256  ;;  %p911_p2 = scmp.lt.s32.totalorder %s1262_s27, %s909_s23 }
  0x71   : > { %p906_p0 = pnand %p904_p12, %p1161_p8  ;;  %p912_p5 = scmp.lt.s32.totalorder %s910_s30, %s903_s13 }
  0x73   : > { %p907_p10 = pneg %p906_p0  ;;  %p913_p7 = por %p912_p5, %p911_p2 }
  0x75   : > { %p914_p6 = pnand %p913_p7, %p907_p10 }
  0x77   : > { %917 = shalt.err (!%p914_p6)
}
  0x78   : > { %749 = dma.hbm_to_vmem [thread:$0]  (!%p1509_p4), %s1259_s28, 128, %s1262_s27, %s1155_s15  }
  0x79   : > { %p1514_p3 = scmp.ne.s32.totalorder %s1508_s20, 0 }
  0x7a   : > { %p1515_p8 = scmp.eq.s32.totalorder (!%p1514_p3), %s1186_s16, 0 }
  0x7b   : > { %290 = sbr.rel (%p1514_p3) target bundleno = 236 (0xec), region = 36 }
  0x82   : > { %1019 = dma.done.wait (%p1515_p8), [#allocation5], 64   ;;  %p1516_p1 = pmov %p1515_p8 }
  0x83   : > { %s1309_s17 = sand.u32 1, %s1044_s22   ;;  %p1517_p4 = scmp.ne.s32.totalorder %s1504_s19, 0 }
  0x84   : > { %1021 = vsyncadd (%p1516_p1), [#allocation5], 4294967232  ;;  %s1312_s8 = sshll.u32 %s1309_s17, 3  ;;  %s297_s7 = scalar_lea.sflag [#allocation3], %s1309_s17 }
  0x85   : > { %s300_s15 = scalar_lea.vmem [#allocation6], %s1312_s8 }
  0x86   : > { %1023 = dma.done.wait (%p1517_p4), %s297_s7, 128  }
  0x87   : > { %1025 = vsyncadd (%p1517_p4), %s297_s7, 4294967168  ;;  %s305_s20 = sand.u32 1, %s1186_s16   ;;  %s309_s27 = scalar_lea.vmem [#allocation7], %s1312_s8 }
  0x88   : > { %s306_s28 = scalar_lea.sflag [#allocation8], %s305_s20 }
  0x89   : > { %1027 = dma.done.wait (%p1517_p4), %s306_s28, 256  }
  0x8a   : > { %1029 = vsyncadd (%p1517_p4), %s306_s28, 4294967040  ;;  %s318_s25 = scalar_lea.vmem [#allocation9], %s1312_s8 }
  0x8b   : > { %323 = sfence }
  0x8c   : > { %v393_v0 = vld [vmem:[%s309_s27] sm:$0xff]  ;;  %v368_v1 = vld [vmem:[%s300_s15] sm:$0xff]  ;;  %s702_s18 = sld [smem:[#allocation2 + $0x81]]  ;;  %s703_s29 = sld [smem:[#allocation2 + $0x82]] }
  0x8d   : > { %v418_v2 = vld [vmem:[%s318_s25] sm:$0xff]  ;;  %v706_v3 = vmul.f32 -1.442695, %v393_v0  ;;  %v701_v4 = vmul.f32 -1.442695, %v368_v1  ;;  %s1329_s10 = sld [smem:[#allocation2 + $0x1]] }
  0x8e   : > { %v711_v5 = vmul.f32 -1.442695, %v418_v2  ;;  %s1331_s9 = sld [smem:[#allocation2 + $0x2]]  ;;  %s1333_s19 = sld [smem:[#allocation2 + $0x101]]  ;;  %v398_v7 = vmax.f32 %v393_v0, 0.0  ;;  %v373_v12 = vmax.f32 %v368_v1, 0.0 }
  0x8f   : > { %797 = vpow2.f32 %v706_v3  ;;  %s1335_s11 = sld [smem:[#allocation2 + $0x102]]  ;;  %s1337_s2 = sld [smem:[#allocation2 + $0x83]]  ;;  %v423_v17 = vmax.f32 %v418_v2, 0.0 }
  0x90   : > { %799 = vpow2.f32 %v701_v4  ;;  %s1339_s13 = sld [smem:[#allocation2 + $0x3]]  ;;  %s1345_s23 = sld [smem:[#allocation2 + $0x84]] }
  0x91   : > { %801 = vpow2.f32 %v711_v5  ;;  %s1341_s26 = sld [smem:[#allocation2 + $0x103]]  ;;  %s1349_s30 = sld [smem:[#allocation2 + $0x4]] }
  0x92   : > { %803 = vtanh.f32 %v393_v0  ;;  %v395_v9 = vstv %s702_s18  ;;  %v399_v10 = vstv %s703_s29  ;;  %s1352_s7 = sld [smem:[#allocation2 + $0x104]]  ;;  %s360_s15 = scalar_lea.vmem [#allocation11], %s1312_s8 }
  0x93   : > { %805 = vtanh.f32 %v368_v1  ;;  %v370_v14 = vstv %s1329_s10  ;;  %v396_v21 = vmul.f32 %v395_v9, %v393_v0  ;;  %v400_v22 = vmul.f32 %v399_v10, %v398_v7  ;;  %s480_s28 = sshll.u32 %s360_s15, 4  ;;  %s353_s27 = scalar_lea.vmem [#allocation10], %s1312_s8  ;;  %s1362_s28 = int_to_ptr.vmem [resolvable:$true] %s480_s28 }
  0x94   : > { %807 = vtanh.f32 %v418_v2  ;;  %v374_v15 = vstv %s1331_s9  ;;  %v420_v18 = vstv %s1333_s19  ;;  %v371_v25 = vmul.f32 %v370_v14, %v368_v1  ;;  %s467_s25 = sshll.u32 %s353_s27, 4  ;;  %s715_s18 = sshll.u32 %s1186_s16, 7  ;;  %s1364_s25 = int_to_ptr.vmem [resolvable:$true] %s467_s25 }
  0x95   : > { %v424_v19 = vstv %s1335_s11  ;;  %v404_v24 = vstv %s1337_s2  ;;  %v375_v26 = vmul.f32 %v374_v15, %v373_v12  ;;  %v421_v29 = vmul.f32 %v420_v18, %v418_v2  ;;  %s367_s29 = scalar_lea.vmem [#allocation13], %s1312_s8  ;;  %s1372_s11 = scalar_lea.hbm %s1483_s5, %s715_s18 }
  0x96   : > { %v379_v28 = vstv %s1339_s13  ;;  %v425_v30 = vmul.f32 %v424_v19, %v423_v17  ;;  %v401_v33 = vadd.f32 %v400_v22, %v396_v21  ;;  %v414_v39 = vstv %s1345_s23  ;;  %s493_s10 = sshll.u32 %s367_s29, 4  ;;  %s1388_s9 = scalar_lea.sflag [#allocation12], %s305_s20  ;;  %s1379_s10 = int_to_ptr.vmem [resolvable:$true] %s493_s10 }
  0x97   : > { %v429_v32 = vstv %s1341_s26  ;;  %v376_v35 = vadd.f32 %v375_v26, %v371_v25  ;;  %v389_v41 = vstv %s1349_s30  ;;  %s1377_s26 = scalar_lea.hbm %s1482_s4, %s715_s18  ;;  %s918_s19 = scalar_lea.vmem %s1362_s28, 128 }
  0x98   : > { %v426_v37 = vadd.f32 %v425_v30, %v421_v29  ;;  %v439_v44 = vstv %s1352_s7  ;;  %s1384_s7 = scalar_lea.hbm %s1484_s6, %s715_s18  ;;  %p919_p5 = scmp.ne.s32.totalorder %s1362_s28, %s918_s19 }
  0x99   : > { %v798_v6 = vpop.eup %797  ;;  %p1518_p11 = scmp.ne.s32.totalorder %s1506_s12, 0  ;;  %s1058_s2 = smov [#allocation11]  }
  0x9a   : > { %v800_v8 = vpop.eup %799  ;;  %v411_v11 = vadd.f32 1.0, %v798_v6  ;;  %s922_s13 = sshll.u32 %s1058_s2, 4  ;;  %s923_s13 = int_to_ptr.vmem [resolvable:$false] %s922_s13 }
  0x9b   : > { %v802_v13 = vpop.eup %801  ;;  %v386_v16 = vadd.f32 1.0, %v800_v8  ;;  %p920_p13 = pnand %p919_p5, %p1518_p11  ;;  %p925_p12 = scmp.lt.s32.totalorder %s1362_s28, %s923_s13 }
  0x9c   : > { %809 = vrcp.f32 %v411_v11  ;;  %v436_v20 = vadd.f32 1.0, %v802_v13  ;;  %v804_v23 = vpop.eup %803 }
  0x9d   : > { %811 = vrcp.f32 %v386_v16  ;;  %v806_v27 = vpop.eup %805  ;;  %v405_v34 = vmul.f32 %v804_v23, %v404_v24  ;;  %p921_p9 = pneg %p920_p13 }
  0x9e   : > { %813 = vrcp.f32 %v436_v20  ;;  %v808_v31 = vpop.eup %807  ;;  %v380_v36 = vmul.f32 %v806_v27, %v379_v28 }
  0x9f   : > { %v430_v38 = vmul.f32 %v808_v31, %v429_v32  ;;  %v406_v40 = vadd.f32 %v405_v34, %v401_v33 }
  0xa0   : > { %v381_v43 = vadd.f32 %v380_v36, %v376_v35 }
  0xa1   : > { %v431_v47 = vadd.f32 %v430_v38, %v426_v37 }
  0xa6   : > { %v810_v42 = vpop.eup %809 }
  0xa7   : > { %v812_v45 = vpop.eup %811  ;;  %v415_v46 = vmul.f32 %v810_v42, %v414_v39 }
  0xa8   : > { %v814_v48 = vpop.eup %813  ;;  %v390_v49 = vmul.f32 %v812_v45, %v389_v41 }
  0xa9   : > { %v416_v50 = vadd.f32 %v415_v46, %v406_v40  ;;  %v440_v51 = vmul.f32 %v814_v48, %v439_v44 }
  0xaa   : > { %v391_v52 = vadd.f32 %v390_v49, %v381_v43 }
  0xab   : > { %417 = vst [vmem:[%s360_s15] sm:$0xff] %v416_v50  ;;  %v441_v53 = vadd.f32 %v440_v51, %v431_v47  ;;  %s924_s15 = scalar_lea.vmem %s923_s13, 256 }
  0xac   : > { %392 = vst [vmem:[%s353_s27] sm:$0xff] %v391_v52  ;;  %p926_p0 = scmp.lt.s32.totalorder %s924_s15, %s918_s19 }
  0xae   : > { %p927_p10 = por %p926_p0, %p925_p12 }
  0xb0   : > { %p928_p2 = pnand %p927_p10, %p921_p9 }
  0xb2   : > { %931 = shalt.err (!%p928_p2)
}
  0xb3   : > { %s932_s16 = scalar_lea.hbm %s1372_s11, 128  ;;  %s936_s18 = scalar_lea.hbm %s1483_s5, 256 }
  0xb4   : > { %p933_p7 = scmp.ne.s32.totalorder %s1372_s11, %s932_s16  ;;  %p937_p8 = scmp.lt.u32.totalorder %s1372_s11, %s1483_s5 }
  0xb5   : > { %p938_p1 = scmp.lt.u32.totalorder %s936_s18, %s932_s16  ;;  %p940_p5 = scmp.lt.u32.totalorder %s932_s16, %s1372_s11 }
  0xb6   : > { %p934_p6 = pnand %p933_p7, %p1518_p11 }
  0xb7   : > { %p939_p4 = por %p938_p1, %p937_p8 }
  0xb8   : > { %p935_p3 = pneg %p934_p6 }
  0xb9   : > { %p941_p13 = por %p940_p5, %p939_p4 }
  0xbb   : > { %p942_p9 = pnand %p941_p13, %p935_p3 }
  0xbd   : > { %945 = shalt.err (!%p942_p9)
}
  0xbe   : > { %731 = dma.vmem_to_hbm [thread:$0]  (%p1518_p11), %s1362_s28, 128, %s1372_s11, %s1388_s9   ;;  %442 = vst [vmem:[%s367_s29] sm:$0xff] %v441_v53 }
  0xbf   : > { %s444_s19 = scalar_lea.sflag [#allocation4], %s1309_s17  ;;  %s946_s2 = scalar_lea.vmem %s1364_s25, 128 }
  0xc0   : > { %p947_p12 = scmp.ne.s32.totalorder %s1364_s25, %s946_s2  ;;  %s1059_s13 = smov [#allocation10]  }
  0xc1   : > { %s950_s15 = sshll.u32 %s1059_s13, 4  ;;  %s951_s15 = int_to_ptr.vmem [resolvable:$false] %s950_s15 }
  0xc2   : > { %p948_p0 = pnand %p947_p12, %p1518_p11  ;;  %s952_s16 = scalar_lea.vmem %s951_s15, 256 }
  0xc3   : > { %p953_p2 = scmp.lt.s32.totalorder %s1364_s25, %s951_s15  ;;  %p954_p7 = scmp.lt.s32.totalorder %s952_s16, %s946_s2 }
  0xc4   : > { %p949_p10 = pneg %p948_p0 }
  0xc5   : > { %p955_p6 = por %p954_p7, %p953_p2 }
  0xc7   : > { %p956_p3 = pnand %p955_p6, %p949_p10 }
  0xc9   : > { %959 = shalt.err (!%p956_p3)
}
  0xca   : > { %s960_s17 = scalar_lea.hbm %s1377_s26, 128  ;;  %s964_s29 = scalar_lea.hbm %s1482_s4, 256 }
  0xcb   : > { %p961_p8 = scmp.ne.s32.totalorder %s1377_s26, %s960_s17  ;;  %p965_p5 = scmp.lt.u32.totalorder %s1377_s26, %s1482_s4 }
  0xcc   : > { %p966_p13 = scmp.lt.u32.totalorder %s964_s29, %s960_s17  ;;  %p968_p12 = scmp.lt.u32.totalorder %s960_s17, %s1377_s26 }
  0xcd   : > { %p962_p1 = pnand %p961_p8, %p1518_p11 }
  0xce   : > { %p967_p9 = por %p966_p13, %p965_p5 }
  0xcf   : > { %p963_p4 = pneg %p962_p1 }
  0xd0   : > { %p969_p0 = por %p968_p12, %p967_p9 }
  0xd2   : > { %p970_p10 = pnand %p969_p0, %p963_p4 }
  0xd4   : > { %973 = shalt.err (!%p970_p10)
}
  0xd5   : > { %730 = dma.vmem_to_hbm [thread:$0]  (%p1518_p11), %s1364_s25, 128, %s1377_s26, %s444_s19  }
  0xd6   : > { %s974_s27 = scalar_lea.vmem %s1379_s10, 128  ;;  %s1060_s18 = smov [#allocation13]  }
  0xd7   : > { %p975_p2 = scmp.ne.s32.totalorder %s1379_s10, %s974_s27  ;;  %s978_s23 = sshll.u32 %s1060_s18, 4  ;;  %s979_s23 = int_to_ptr.vmem [resolvable:$false] %s978_s23 }
  0xd8   : > { %s980_s30 = scalar_lea.vmem %s979_s23, 256  ;;  %p981_p3 = scmp.lt.s32.totalorder %s1379_s10, %s979_s23 }
  0xd9   : > { %p976_p7 = pnand %p975_p2, %p1518_p11  ;;  %p982_p8 = scmp.lt.s32.totalorder %s980_s30, %s974_s27 }
  0xdb   : > { %p977_p6 = pneg %p976_p7  ;;  %p983_p1 = por %p982_p8, %p981_p3 }
  0xdd   : > { %p984_p4 = pnand %p983_p1, %p977_p6 }
  0xdf   : > { %987 = shalt.err (!%p984_p4)
}
  0xe0   : > { %s988_s25 = scalar_lea.hbm %s1384_s7, 128  ;;  %s992_s2 = scalar_lea.hbm %s1484_s6, 256 }
  0xe1   : > { %p989_p5 = scmp.ne.s32.totalorder %s1384_s7, %s988_s25  ;;  %p993_p12 = scmp.lt.u32.totalorder %s1384_s7, %s1484_s6 }
  0xe2   : > { %p994_p0 = scmp.lt.u32.totalorder %s992_s2, %s988_s25  ;;  %p996_p2 = scmp.lt.u32.totalorder %s988_s25, %s1384_s7 }
  0xe3   : > { %p990_p13 = pnand %p989_p5, %p1518_p11 }
  0xe4   : > { %p995_p10 = por %p994_p0, %p993_p12 }
  0xe5   : > { %p991_p9 = pneg %p990_p13 }
  0xe6   : > { %p997_p7 = por %p996_p2, %p995_p10 }
  0xe8   : > { %p998_p6 = pnand %p997_p7, %p991_p9 }
  0xea   : > { %1001 = shalt.err (!%p998_p6)
}
  0xeb   : > { %732 = dma.vmem_to_hbm [thread:$0]  (%p1518_p11), %s1379_s10, 128, %s1384_s7, %s1388_s9  }
  0xec PF: > { %s505_s16 = sand.u32 1, %s1040_s21   ;;  %p1519_p3 = scmp.ne.s32.totalorder %s1507_s14, 0 }
  0xed   : > { %p1520_p8 = scmp.ge.s32.totalorder %s1052_s24, 2  ;;  %s506_s17 = scalar_lea.sflag [#allocation4], %s505_s16 }
  0xef   : > { %p751_p1 = pnand %p1520_p8, %p1519_p3 }
  0xf1   : > { %1031 = dma.done.wait (!%p751_p1), %s506_s17, 128  }
  0xf2   : > { %1033 = vsyncadd (!%p751_p1), %s506_s17, 4294967168  ;;  %s1521_s8 = sadd.s32 4294967294, %s1052_s24  }
  0xf3   : > { %s514_s28 = sand.u32 1, %s1521_s8  }
  0xf4   : > { %s515_s29 = scalar_lea.sflag [#allocation12], %s514_s28 }
  0xf5   : > { %1035 = dma.done.wait (!%p751_p1), %s515_s29, 256  }
  0xf6   : > { %1037 = vsyncadd (!%p751_p1), %s515_s29, 4294967040  ;;  %s1522_s24 = sld [smem:[#allocation20_spill]]  ;;  %s1523_s12 = sld [smem:[#allocation19_spill]] }
  0xf7   : > { %s1524_s23 = sld [smem:[#allocation21_spill]]  ;;  %s1525_s21 = smov %s1044_s22 }
  0xfc   : > { %p27_p11 = scmp.ge.s32.totalorder %s1522_s24, 4   ;;  %s1526_s22 = smov %s1523_s12 }
  0xfe   :  { %29 = sbr.rel (!%p27_p11) target bundleno = 12 (0xc), region = 142 }
 0x105   :  { %529 = vsyncpa [#allocation3], 1 }
 0x106   :  { %531 = vsyncpa [#allocation3 + $0x1], 1 }
 0x107   :  { %532 = vsyncpa [#allocation8], 1 }
 0x108   :  { %534 = vsyncpa [#allocation8 + $0x1], 1 }
 0x109   :  { %535 = vsyncpa [#allocation4], 1 }
 0x10a   :  { %537 = vsyncpa [#allocation4 + $0x1], 1 }
 0x10b   :  { %538 = vsyncpa [#allocation12], 1 }
 0x10c   :  { %540 = vsyncpa [#allocation12 + $0x1], 1 }
 0x10d   :  { %541 = vsyncpa [#allocation5], 1 }
 0x10e   :  { %543 = vsyncpa [#allocation5 + $0x1], 1 }

</bundles_post_ra>
